<compile_context>
chip_gen: v5e
topology: v5e:2x2
jax: 0.10.0
libtpu: 0.0.40
codegen_flags: <defaults>
</compile_context>

<pallas_src>
import functools

import jax
import jax.numpy as jnp
from jax import lax
from jax.experimental import pallas as pl
from jax.experimental.pallas import tpu as pltpu


def _mha_kernel(x_ref, wqkv_ref, wout_ref, o_ref, acc_ref, *, k_dim):
    # x_ref:    (1, S, E)   current batch element
    # wqkv_ref: (1, E, 3K)  fused [wq | wk | wv] for the current head
    # wout_ref: (1, K, E)   rows h*K:(h+1)*K of the output projection
    # o_ref:    (1, S, E)   resident across the head axis
    # acc_ref:  (S, E)      float32 accumulator scratch
    h = pl.program_id(1)

    @pl.when(h == 0)
    def _():
        acc_ref[...] = jnp.zeros_like(acc_ref)

    x = x_ref[0]                                   # (S, E)

    # Fused QKV projection: one wide MXU matmul, then cheap static lane slices.
    qkv = jnp.dot(x, wqkv_ref[0], preferred_element_type=jnp.float32)  # (S, 3K)
    q = qkv[:, :k_dim]
    k = qkv[:, k_dim:2 * k_dim]
    v = qkv[:, 2 * k_dim:]

    # q @ k^T without materializing a transpose: contract the last dims.
    scale = 1.0 / (float(k_dim) ** 0.5)
    scores = lax.dot_general(
        q, k,
        dimension_numbers=(((1,), (1,)), ((), ())),
        preferred_element_type=jnp.float32,
    ) * scale                                      # (S, S)

    # Numerically-stable softmax; normalize with EUP approx reciprocal.
    m = jnp.max(scores, axis=-1, keepdims=True)
    p = jnp.exp(scores - m)
    denom = jnp.sum(p, axis=-1, keepdims=True)
    attn = p * pl.reciprocal(denom, approx=True)

    head_out = jnp.dot(attn, v, preferred_element_type=jnp.float32)    # (S, K)

    # Fold this head straight into the final output projection.
    acc_ref[...] += jnp.dot(head_out, wout_ref[0],
                            preferred_element_type=jnp.float32)        # (S, E)

    @pl.when(h == pl.num_programs(1) - 1)
    def _():
        o_ref[0] = acc_ref[...].astype(o_ref.dtype)


def multi_head_attention(x, wq, wk, wv, w_out):
    """x: (B, S, E); wq/wk/wv: (H, E, K); w_out: (H*K, E)  ->  (B, S, E)."""
    B, S, E = x.shape
    H, _, K = wq.shape

    # One-time wrapper-side weight packing:
    #   fused per-head QKV weight (E, 3K) and per-head output-projection slice.
    wqkv = jnp.concatenate([wq, wk, wv], axis=-1)   # (H, E, 3K)
    wout = w_out.reshape(H, K, E)                   # (H, K, E)

    kernel = functools.partial(_mha_kernel, k_dim=K)

    return pl.pallas_call(
        kernel,
        out_shape=jax.ShapeDtypeStruct((B, S, E), x.dtype),
        grid_spec=pltpu.PrefetchScalarGridSpec(
            num_scalar_prefetch=0,
            grid=(B, H),
            in_specs=[
                pl.BlockSpec((1, S, E), lambda b, h: (b, 0, 0)),       # x
                pl.BlockSpec((1, E, 3 * K), lambda b, h: (h, 0, 0)),   # fused qkv W
                pl.BlockSpec((1, K, E), lambda b, h: (h, 0, 0)),       # out-proj slice
            ],
            out_specs=pl.BlockSpec((1, S, E), lambda b, h: (b, 0, 0)),
            scratch_shapes=[pltpu.VMEM((S, E), jnp.float32)],
        ),
        compiler_params=pltpu.CompilerParams(
            dimension_semantics=("parallel", "arbitrary"),
        ),
    )(x, wqkv, wout)


def multi_head_attention_ref(x, wq, wk, wv, w_out):
    """Plain-JAX reference matching the PyTorch MultiHeadAttentionV1 forward."""
    B, S, E = x.shape
    H, _, K = wq.shape
    q = jnp.einsum("bse,hek->bhsk", x, wq)
    k = jnp.einsum("bse,hek->bhsk", x, wk)
    v = jnp.einsum("bse,hek->bhsk", x, wv)
    scores = jnp.einsum("bhqk,bhsk->bhqs", q, k) / (float(K) ** 0.5)
    attn = jax.nn.softmax(scores, axis=-1)
    heads = jnp.einsum("bhqs,bhsk->bhqk", attn, v)            # (B, H, S, K)
    heads = jnp.transpose(heads, (0, 2, 1, 3)).reshape(B, S, H * K)
    return heads @ w_out


if __name__ == "__main__":
    B, S, E, K, H = 2, 8, 32, 32, 2

    key = jax.random.PRNGKey(0)
    kx, kq, kk, kv, kw = jax.random.split(key, 5)

    x = jax.random.normal(kx, (B, S, E), dtype=jnp.float32)
    # Parameters: standard-normal init, shapes matching the torch module
    # (one (E, K) wq/wk/wv per head, plus the (H*K, E) output projection).
    wq = jax.random.normal(kq, (H, E, K), dtype=jnp.float32)
    wk = jax.random.normal(kk, (H, E, K), dtype=jnp.float32)
    wv = jax.random.normal(kv, (H, E, K), dtype=jnp.float32)
    w_out = jax.random.normal(kw, (H * K, E), dtype=jnp.float32)

    out = jax.block_until_ready(multi_head_attention(x, wq, wk, wv, w_out))

    ref = multi_head_attention_ref(x, wq, wk, wv, w_out)
    assert out.shape == (B, S, E)
    # Relative-to-scale check; slight slack for the approximate EUP reciprocal.
    rel_err = jnp.max(jnp.abs(out - ref)) / (jnp.max(jnp.abs(ref)) + 1e-6)
    assert rel_err < 5e-3, f"rel_err={rel_err}"

    print("KERNEL_OK")
</pallas_src>

<mosaic_0001>
module attributes {stable_mosaic.version = 11 : i64} {
  func.func @_mha_kernel(%arg0: i32, %arg1: i32, %arg2: memref<1x8x32xf32, #tpu.memory_space<vmem>>, %arg3: memref<1x32x96xf32, #tpu.memory_space<vmem>>, %arg4: memref<1x32x32xf32, #tpu.memory_space<vmem>>, %arg5: memref<1x8x32xf32, #tpu.memory_space<vmem>>, %arg6: memref<8x32xf32, #tpu.memory_space<vmem>>) attributes {dimension_semantics = [#tpu.dimension_semantics<parallel>, #tpu.dimension_semantics<arbitrary>], iteration_bounds = array<i64: 2, 2>, scalar_prefetch = 0 : i64, scratch_operands = 1 : i64, tpu.core_type = #tpu.core_type<tc>, window_params = [{transform_indices = @transform_0, window_bounds = array<i64: 1, 8, 32>}, {transform_indices = @transform_1, window_bounds = array<i64: 1, 32, 96>}, {transform_indices = @transform_2, window_bounds = array<i64: 1, 32, 32>}, {transform_indices = @transform_3, window_bounds = array<i64: 1, 8, 32>}]} {
    %c0_i32 = arith.constant 0 : i32
    %0 = arith.cmpi eq, %arg1, %c0_i32 : i32
    %1 = arith.extui %0 : i1 to i32
    %c0_i32_0 = arith.constant 0 : i32
    %2 = arith.cmpi ne, %1, %c0_i32_0 : i32
    scf.if %2 {
      %cst_20 = arith.constant 0.000000e+00 : f32
      %34 = vector.broadcast %cst_20 : f32 to vector<8x32xf32>
      %c0_21 = arith.constant 0 : index
      %c0_22 = arith.constant 0 : index
      %35 = vector.load %arg6[%c0_21, %c0_22] : memref<8x32xf32, #tpu.memory_space<vmem>>, vector<8x32xf32>
      tpu.vector_store %arg6[%c0_21, %c0_22], %34 {strides = array<i32>} : memref<8x32xf32, #tpu.memory_space<vmem>>, vector<8x32xf32>,
    } else {
    }
    %c0 = arith.constant 0 : index
    %c0_1 = arith.constant 0 : index
    %c0_2 = arith.constant 0 : index
    %3 = vector.load %arg2[%c0, %c0_1, %c0_2] : memref<1x8x32xf32, #tpu.memory_space<vmem>>, vector<1x8x32xf32>
    %4 = vector.shape_cast %3 : vector<1x8x32xf32> to vector<8x32xf32>
    %c0_3 = arith.constant 0 : index
    %c0_4 = arith.constant 0 : index
    %c0_5 = arith.constant 0 : index
    %5 = vector.load %arg3[%c0_3, %c0_4, %c0_5] : memref<1x32x96xf32, #tpu.memory_space<vmem>>, vector<1x32x96xf32>
    %6 = vector.shape_cast %5 : vector<1x32x96xf32> to vector<32x96xf32>
    %cst = arith.constant dense<0.000000e+00> : vector<8x96xf32>
    %7 = tpu.matmul %4, %6, %cst {dimension_numbers = #tpu.dot_dimension_numbers<[1], [0], [0], [1], [0, 0, 1, 1], [], []>} : vector<8x32xf32>, vector<32x96xf32>, vector<8x96xf32> -> vector<8x96xf32>
    %8 = vector.extract_strided_slice %7 {offsets = [0, 0], sizes = [8, 32], strides = [1, 1]} : vector<8x96xf32> to vector<8x32xf32>
    %9 = vector.extract_strided_slice %7 {offsets = [0, 32], sizes = [8, 32], strides = [1, 1]} : vector<8x96xf32> to vector<8x32xf32>
    %10 = vector.extract_strided_slice %7 {offsets = [0, 64], sizes = [8, 32], strides = [1, 1]} : vector<8x96xf32> to vector<8x32xf32>
    %cst_6 = arith.constant dense<0.000000e+00> : vector<8x8xf32>
    %11 = tpu.matmul %8, %9, %cst_6 {dimension_numbers = #tpu.dot_dimension_numbers<[1], [1], [0], [0], [0, 0, 1, 0], [], []>} : vector<8x32xf32>, vector<8x32xf32>, vector<8x8xf32> -> vector<8x8xf32>
    %cst_7 = arith.constant 0.176776692 : f32
    %12 = vector.broadcast %cst_7 : f32 to vector<8x8xf32>
    %13 = arith.mulf %11, %12 : vector<8x8xf32>
    %cst_8 = arith.constant dense<0xFF800000> : vector<8xf32>
    %14 = vector.multi_reduction <maximumf>, %13, %cst_8 [1] : vector<8x8xf32> to vector<8xf32>
    %15 = vector.shape_cast %14 : vector<8xf32> to vector<8x1xf32>
    %16 = vector.broadcast %15 : vector<8x1xf32> to vector<8x8xf32>
    %17 = arith.subf %13, %16 : vector<8x8xf32>
    %18 = math.exp %17 : vector<8x8xf32>
    %cst_9 = arith.constant dense<0.000000e+00> : vector<8xf32>
    %19 = vector.multi_reduction <add>, %18, %cst_9 [1] : vector<8x8xf32> to vector<8xf32>
    %20 = vector.shape_cast %19 : vector<8xf32> to vector<8x1xf32>
    %21 = tpu.reciprocal %20 {approx = true} : vector<8x1xf32> -> vector<8x1xf32>
    %22 = vector.broadcast %21 : vector<8x1xf32> to vector<8x8xf32>
    %23 = arith.mulf %18, %22 : vector<8x8xf32>
    %cst_10 = arith.constant dense<0.000000e+00> : vector<8x32xf32>
    %24 = tpu.matmul %23, %10, %cst_10 {dimension_numbers = #tpu.dot_dimension_numbers<[1], [0], [0], [1], [0, 0, 1, 1], [], []>} : vector<8x8xf32>, vector<8x32xf32>, vector<8x32xf32> -> vector<8x32xf32>
    %c0_11 = arith.constant 0 : index
    %c0_12 = arith.constant 0 : index
    %25 = vector.load %arg6[%c0_11, %c0_12] : memref<8x32xf32, #tpu.memory_space<vmem>>, vector<8x32xf32>
    %c0_13 = arith.constant 0 : index
    %c0_14 = arith.constant 0 : index
    %c0_15 = arith.constant 0 : index
    %26 = vector.load %arg4[%c0_13, %c0_14, %c0_15] : memref<1x32x32xf32, #tpu.memory_space<vmem>>, vector<1x32x32xf32>
    %27 = vector.shape_cast %26 : vector<1x32x32xf32> to vector<32x32xf32>
    %cst_16 = arith.constant dense<0.000000e+00> : vector<8x32xf32>
    %28 = tpu.matmul %24, %27, %cst_16 {dimension_numbers = #tpu.dot_dimension_numbers<[1], [0], [0], [1], [0, 0, 1, 1], [], []>} : vector<8x32xf32>, vector<32x32xf32>, vector<8x32xf32> -> vector<8x32xf32>
    %29 = arith.addf %25, %28 : vector<8x32xf32>
    %c0_17 = arith.constant 0 : index
    %c0_18 = arith.constant 0 : index
    %30 = vector.load %arg6[%c0_17, %c0_18] : memref<8x32xf32, #tpu.memory_space<vmem>>, vector<8x32xf32>
    tpu.vector_store %arg6[%c0_17, %c0_18], %29 {strides = array<i32>} : memref<8x32xf32, #tpu.memory_space<vmem>>, vector<8x32xf32>,
    %c1_i32 = arith.constant 1 : i32
    %31 = arith.cmpi eq, %arg1, %c1_i32 : i32
    %32 = arith.extui %31 : i1 to i32
    %c0_i32_19 = arith.constant 0 : i32
    %33 = arith.cmpi ne, %32, %c0_i32_19 : i32
    scf.if %33 {
      %c0_20 = arith.constant 0 : index
      %c0_21 = arith.constant 0 : index
      %34 = vector.load %arg6[%c0_20, %c0_21] : memref<8x32xf32, #tpu.memory_space<vmem>>, vector<8x32xf32>
      %c0_22 = arith.constant 0 : index
      %c0_23 = arith.constant 0 : index
      %c0_24 = arith.constant 0 : index
      %35 = vector.load %arg5[%c0_22, %c0_23, %c0_24] : memref<1x8x32xf32, #tpu.memory_space<vmem>>, vector<1x8x32xf32>
      %36 = vector.shape_cast %35 : vector<1x8x32xf32> to vector<8x32xf32>
      %37 = vector.shape_cast %34 : vector<8x32xf32> to vector<1x8x32xf32>
      tpu.vector_store %arg5[%c0_22, %c0_23, %c0_24], %37 {strides = array<i32>} : memref<1x8x32xf32, #tpu.memory_space<vmem>>, vector<1x8x32xf32>,
    } else {
    }
    return
  }
  func.func @transform_0(%arg0: i32, %arg1: i32) -> (i32, i32, i32) {
    %c0_i32 = arith.constant 0 : i32
    %c0_i32_0 = arith.constant 0 : i32
    %c0_i32_1 = arith.constant 0 : i32
    return %arg0, %c0_i32, %c0_i32_0 : i32, i32, i32
  }
  func.func @transform_1(%arg0: i32, %arg1: i32) -> (i32, i32, i32) {
    %c0_i32 = arith.constant 0 : i32
    %c0_i32_0 = arith.constant 0 : i32
    %c0_i32_1 = arith.constant 0 : i32
    return %arg1, %c0_i32, %c0_i32_0 : i32, i32, i32
  }
  func.func @transform_2(%arg0: i32, %arg1: i32) -> (i32, i32, i32) {
    %c0_i32 = arith.constant 0 : i32
    %c0_i32_0 = arith.constant 0 : i32
    %c0_i32_1 = arith.constant 0 : i32
    return %arg1, %c0_i32, %c0_i32_0 : i32, i32, i32
  }
  func.func @transform_3(%arg0: i32, %arg1: i32) -> (i32, i32, i32) {
    %c0_i32 = arith.constant 0 : i32
    %c0_i32_0 = arith.constant 0 : i32
    %c0_i32_1 = arith.constant 0 : i32
    return %arg0, %c0_i32, %c0_i32_0 : i32, i32, i32
  }
}

</mosaic_0001>

<bundles_post_ra>
// kernel: tpu_custom_call.1
= control target key start
LH: loop header
LB: loop body
LE: loop exit
PB: predicated region body
PF: predicated region fallthrough
CT: control target
= control target key end

     0   :  { %s1225_s0 = inlined_call_operand.hbm [shape: f32[2,8,32], index: 0, kind: input, shape index: {}]   ;;  %s1226_s1 = inlined_call_operand.hbm [shape: f32[2,32,96], index: 1, kind: input, shape index: {}]   ;;  %s1227_s2 = inlined_call_operand.hbm [shape: f32[2,32,32], index: 2, kind: input, shape index: {}]   ;;  %s1228_s3 = inlined_call_operand.hbm [shape: f32[2,8,32], index: 3, kind: output, shape index: {}]  }
   0x1   :  { %1236 = sst [smem:[#allocation20_spill]] %s1226_s1 }
   0x2   :  { %1237 = sst [smem:[#allocation21_spill]] %s1227_s2 }
   0x3   :  { %8 = vsyncpa [#allocation4], 0 }
   0x4   :  { %10 = vsyncpa [#allocation4 + $0x1], 0 }
   0x5   :  { %11 = vsyncpa [#allocation7], 0 }
   0x6   :  { %13 = vsyncpa [#allocation7 + $0x1], 0 }
   0x7   :  { %14 = vsyncpa [#allocation5], 0 }
   0x8   :  { %16 = vsyncpa [#allocation5 + $0x1], 0  ;;  %s952_s12 = smov 0   ;;  %s954_s13 = smov 0  }
   0x9   :  { %s956_s14 = smov 0   ;;  %s958_s15 = smov 0  }
   0xa   :  { %s960_s16 = smov 0   ;;  %s962_s17 = smov 0  }
   0xb   :  { %s964_s18 = smov 0   ;;  %s966_s19 = smov 0  }
   0xc   :  { %s968_s20 = smov 0   ;;  %s970_s21 = smov 0  }
   0xd   :  { %s972_s22 = smov 0  }
   0xe LB: > { %1238 = sst [smem:[#allocation13_spill]] %s893_s14  ;;  %s31_s23 = sadd.s32 1, %s917_s20  ;;  %s925_s22 = sphi %s972_s22, %s22_s22   ;;  %s921_s21 = sphi %s970_s21, %s1270_s21   ;;  %s917_s20 = sphi %s968_s20, %s1269_s20   ;;  %s913_s19 = sphi %s966_s19, %s1268_s19   ;;  %s909_s18 = sphi %s964_s18, %s1261_s18   ;;  %s905_s17 = sphi %s962_s17, %s1260_s17   ;;  %s901_s16 = sphi %s960_s16, %s1267_s16   ;;  %s897_s15 = sphi %s958_s15, %s1266_s15   ;;  %s893_s14 = sphi %s956_s14, %s1258_s14   ;;  %s889_s13 = sphi %s954_s13, %s1265_s13   ;;  %s885_s12 = sphi %s952_s12, %s1264_s12  }
   0xf   : > { %1239 = sst [smem:[#allocation14_spill]] %s905_s17  ;;  %p49_p0 = scmp.eq.s32.totalorder %s925_s22, 0 }
  0x10   : > { %1240 = sst [smem:[#allocation15_spill]] %s917_s20  ;;  %p1009_p1 = scmp.ge.s32.totalorder %s31_s23, 2 }
  0x11   : > { %s67_s25 = sadd.s32 1, %s893_s14  ;;  %p74_p2 = scmp.ne.s32.totalorder %s893_s14, %s889_s13 }
  0x12   : > { %s1272_s23 = smov (%p1009_p1, %s31_s23), 0  ;;  %p610_p4 = scmp.lt.s32.totalorder %s925_s22, 4 }
  0x13   : > { %1242 = sst [smem:[#allocation16_spill]] %s1272_s23  ;;  %p1022_p3 = por %p74_p2, %p49_p0 }
  0x14   : > { %s64_s27 = ssub.s32 %s917_s20, %s1272_s23  ;;  %s175_s28 = sand.u32 1, %s925_s22  }
  0x15   : > { %p65_p5 = scmp.eq.s32.totalorder %s64_s27, 0  ;;  %s177_s29 = sand.u32 1, %s893_s14  }
  0x16   : > { %s564_s4 = sshll.u32 %s177_s29, 5  ;;  %s586_s5 = sshll.u32 %s917_s20, 5 }
  0x17   : > { %s1032_s30 = scalar_select %p65_p5, %s893_s14, %s67_s25  }
  0x18   : > { %s1245_s1 = sld [smem:[#allocation20_spill]]  ;;  %s179_s10 = scalar_lea.vmem [#allocation6], %s564_s4 }
  0x19   : > { %1244 = sst [smem:[#allocation17_spill]] %s1032_s30  ;;  %s187_s11 = sshll.u32 %s179_s10, 4  ;;  %s188_s11 = int_to_ptr.vmem [resolvable:$true] %s187_s11 }
  0x1a   : > { %p1042_p6 = pnand %p610_p4, %p1022_p3  ;;  %s1247_s2 = sld [smem:[#allocation21_spill]] }
  0x1b   : > { %s1049_s7 = scalar_lea.sflag [#allocation7], %s175_s28  ;;  %s1230_s26 = smov 8  }
  0x1c   : > { %p80_p7 = scmp.ne.s32.totalorder %s889_s13, %s885_s12  ;;  %s201_s28 = scalar_lea.vmem [#allocation8], %s564_s4 }
  0x1d   : > { %s1061_s10 = sshll.u32 %s201_s28, 4  ;;  %p570_p8 = scmp.ge.s32.totalorder %s925_s22, 1  ;;  %s210_s10 = int_to_ptr.vmem [resolvable:$true] %s1061_s10 }
  0x1e   : > { %s184_s8 = scalar_lea.hbm %s1245_s1, %s586_s5  ;;  %p217_p9 = scmp.lt.s32.totalorder %s925_s22, 5 }
  0x1f   : > { %s185_s9 = sshll.u32 %s184_s8, 4  ;;  %s1229_s8 = smov 128   ;;  %s186_s9 = int_to_ptr.hbm [resolvable:$true] %s185_s9 }
  0x20   : > { %s206_s6 = scalar_lea.hbm %s1247_s2, %s586_s5  ;;  %p1065_p10 = pnand %p570_p8, %p217_p9 }
  0x21   : > { %602 = dma.hbm_to_vmem [thread:$0]  (!%p1042_p6), %s186_s9, 512, %s188_s11, %s1049_s7, %s1229_s8, %s1229_s8, %s1230_s26  }
  0x22   : > { %s207_s5 = sshll.u32 %s206_s6, 4  ;;  %s1071_s11 = sadd.s32 4294967295, %s925_s22   ;;  %s1059_s5 = int_to_ptr.hbm [resolvable:$true] %s207_s5 }
  0x23   : > { %s34_s4 = sadd.s32 1, %s921_s21  ;;  %s559_s25 = sadd.s32 4294967294, %s925_s22  }
  0x24   : > { %s1274_s4 = smov (!%p1009_p1, %s34_s4), %s921_s21  ;;  %s41_s29 = sadd.s32 1, %s905_s17 }
  0x25   : > { %p36_p11 = scmp.ge.s32.totalorder %s1274_s4, 2  ;;  %p54_p12 = scmp.ne.s32.totalorder %s901_s16, %s897_s15 }
  0x26   : > { %p48_p13 = scmp.ne.s32.totalorder %s905_s17, %s901_s16  ;;  %p55_p2 = scmp.eq.s32.totalorder %s1071_s11, 0 }
  0x27   : > { %s1276_s4 = smov (%p36_p11, %s1274_s4), 0  ;;  %p130_p5 = scmp.eq.s32.totalorder %s1071_s11, 3 }
  0x28   : > { %1249 = sst [smem:[#allocation18_spill]] %s1276_s4  ;;  %p1089_p3 = por %p55_p2, %p54_p12 }
  0x29   : > { %p1096_p1 = por %p80_p7, %p55_p2  ;;  %s38_s28 = ssub.s32 %s921_s21, %s1276_s4 }
  0x2a   : > { %p39_p8 = scmp.eq.s32.totalorder %s38_s28, 0  ;;  %p136_p9 = scmp.eq.s32.totalorder %s559_s25, 3 }
  0x2b   : > { %p1103_p11 = por %p130_p5, %p48_p13  ;;  %s156_s26 = sand.u32 1, %s905_s17  }
  0x2c   : > { %s1109_s1 = scalar_select %p39_p8, %s905_s17, %s41_s29  }
  0x2d   : > { %p50_p7 = por %p49_p0, %p48_p13  ;;  %p1116_p2 = por %p136_p9, %p54_p12 }
  0x2e   : > { %1253 = sst [smem:[#allocation19_spill]] %s1109_s1  ;;  %s562_s28 = sshll.u32 %s156_s26, 3 }
  0x2f   : > { %s563_s2 = sshll.u32 %s921_s21, 3  ;;  %s160_s30 = scalar_lea.vmem [#allocation3], %s562_s28 }
  0x30   : > { %s164_s25 = scalar_lea.hbm %s1225_s0, %s563_s2  ;;  %s168_s14 = sshll.u32 %s160_s30, 4  ;;  %s169_s14 = int_to_ptr.vmem [resolvable:$true] %s168_s14 }
  0x31   : > { %s166_s20 = sshll.u32 %s164_s25, 4  ;;  %p597_p5 = pnand %p610_p4, %p50_p7  ;;  %s167_s20 = int_to_ptr.hbm [resolvable:$true] %s166_s20 }
  0x32   : > { %s1255_s29 = smov 8   ;;  %s1256_s1 = smov 128  }
  0x33   : > { %605 = dma.hbm_to_vmem [thread:$0]  (!%p1042_p6), %s1059_s5, 512, %s210_s10, %s1049_s7, %s1256_s1, %s1256_s1, %s1255_s29  }
  0x34   : > { %s157_s17 = scalar_lea.sflag [#allocation4], %s156_s26  ;;  %221 = sbr.rel (%p1065_p10) target bundleno = 1012 (0x3f4), region = 32 }
  0x35   : > { %599 = dma.hbm_to_vmem [thread:$0]  (!%p597_p5), %s167_s20, 128, %s169_s14, %s157_s17  }
  0x36   : > { %s1138_s2 = sand.u32 (!%p1065_p10), 1, %s901_s16  }
  0x37   : > { %s571_s23 = sshll.u32 (!%p1065_p10), %s1138_s2, 3  ;;  %s224_s30 = scalar_lea.sflag (!%p1065_p10), [#allocation4], %s1138_s2 }
  0x38   : > { %s227_s4 = scalar_lea.vmem (!%p1065_p10), [#allocation3], %s571_s23 }
  0x39   : > { %872 = dma.done.wait (%p1089_p3), %s224_s30, 128  }
  0x3a   : > { %874 = vsyncadd (%p1089_p3), %s224_s30, 4294967168  ;;  %s233_s1 = sand.u32 1, %s1071_s11   ;;  %s235_s14 = sand.u32 1, %s889_s13  }
  0x3b   : > { %s572_s17 = sshll.u32 %s235_s14, 5  ;;  %s234_s20 = scalar_lea.sflag [#allocation7], %s233_s1 }
  0x3c   : > { %s237_s27 = scalar_lea.vmem [#allocation6], %s572_s17 }
  0x3d   : > { %876 = dma.done.wait (%p1096_p1), %s234_s20, 1024  }
  0x3e   : > { %878 = vsyncadd (%p1096_p1), %s234_s20, 4294966272  ;;  %s1152_s7 = scalar_lea.vmem [#allocation8], %s572_s17  ;;  %s1154_s26 = scalar_lea.vmem [#allocation9], %s571_s23 }
  0x3f   : > { %p575_p0 = scmp.ne.s32.totalorder %s909_s18, 0 }
  0x41   : > { %284 = sbr.rel (%p575_p0) target bundleno = 72 (0x48), region = 48 }
  0x46   : > { %vm285_vm0 = vcmask 261120   ;;  %v929_v0 = vmov 0.0  }
  0x47   : > { %286 = vst.msk [vmem:[#allocation2] sm:$0xff] %vm285_vm0, %v929_v0 }
  0x48 PF: > { %v291_v1 = vld [vmem:[%s237_s27 + $0x18] sm:$0xff]  ;;  %v290_v2 = vld [vmem:[%s237_s27 + $0x10] sm:$0xff]  ;;  %v289_v3 = vld [vmem:[%s237_s27 + $0x8] sm:$0xff]  ;;  %vm292_vm1 = vcmask 261120   ;;  %s930_s5 = smov 96   ;;  %vm344_vm2 = vcmask 64512  }
  0x49   : > { %308 = vmatpush.msra.mxu0 %v291_v1  ;;  %v288_v4 = vld [vmem:[%s237_s27] sm:$0xff]  ;;  %v287_v5 = vld [vmem:[%s227_s4] sm:$0xff]  ;;  %s931_s10 = smov 64   ;;  %v384_v18 = vld [vmem:[%s1152_s7 + $0x8] sm:$0xff]  ;;  %p581_p4 = scmp.ne.s32.totalorder %s909_s18, 1 }
  0x4a   : > { %v386_v16 = vld [vmem:[%s1152_s7 + $0x18] sm:$0xff]  ;;  %v385_v17 = vld [vmem:[%s1152_s7 + $0x10] sm:$0xff]  ;;  %v383_v23 = vld [vmem:[%s1152_s7] sm:$0xff] }
  0x4b   : > { %309 = vmatpush.msra.mxu0 %v290_v2  ;;  %402 = vmatpush.msra.mxu3 %v386_v16 }
  0x4d   : > { %310 = vmatpush.msra.mxu0 %v289_v3  ;;  %403 = vmatpush.msra.mxu3 %v385_v17 }
  0x4e   : > { %v382_v25 = vld [vmem:[#allocation2] sm:$0xff] }
  0x4f   : > { %311 = vmatpush.msra.mxu0 %v288_v4  ;;  %404 = vmatpush.msra.mxu3 %v384_v18 }
  0x50   : > { %576 = vmatmul.msk.f32.vlgmr.msra.gmra.mxu0 %vm292_vm1, %v287_v5 }
  0x51   : > { %405 = vmatpush.msra.mxu3 %v383_v23 }
  0xcd   : > { %v313_v6 = vpop.f32.mrf.mxu0 }
  0xce   : > { %317 = vrot.lane.b32.xlu0 %v313_v6, %s930_s5 }
 0x140   : > { %v318_v7 = vpop.permute.xlu0 %317 }
 0x141   : > { %577 = vmatpush.xpose.msk.msra.mxu1 %vm292_vm1, %v318_v7 }
 0x144   : > { %578 = vmatmul.msk.f32.vlgmr.msra.gmra.mxu1 %vm292_vm1, %v313_v6 }
 0x1c1   : > { %v340_v8 = vpop.f32.mrf.mxu1 }
 0x1c2   : > { %v343_v9 = vmul.f32 0.17677669, %v340_v8 }
 0x1c4   : > { %v345_v10 = vsel %vm344_vm2, %v343_v9, -inf }
 0x1c5   : > { %346 = vmax.xlane.f32.xlu0 %v345_v10 }
 0x238   : > { %v347_v11 = vpop.xlane.xlu0 %346 }
 0x239   : > { %v348_v12 = vsub.f32 %v343_v9, %v347_v11 }
 0x23b   : > { %v349_v13 = vmul.f32 1.442695, %v348_v12 }
 0x23d   : > { %705 = vpow2.f32 %v349_v13 }
 0x243   : > { %v706_v14 = vpop.eup %705 }
 0x244   : > { %v351_v15 = vsel %vm344_vm2, %v706_v14, 0.0 }
 0x245   : > { %352 = vadd.xlane.f32.xlu1 %v351_v15 }
 0x25e   : > { %356 = vrot.lane.b32.xlu1 %v313_v6, %s931_s10 }
 0x2b8   : > { %v353_v19 = vpop.xlane.xlu1 %352 }
 0x2b9   : > { %707 = vrcp.f32 %v353_v19 }
 0x2bf   : > { %v708_v20 = vpop.eup %707 }
 0x2c0   : > { %v355_v22 = vmul.f32 %v708_v20, %v706_v14 }
 0x2d0   : > { %v357_v21 = vpop.permute.xlu1 %356 }
 0x2d1   : > { %377 = vmatpush.msra.mxu2 %v357_v21 }
 0x2d2   : > { %579 = vmatmul.msk.f32.vlgmr.msra.gmra.mxu2 %vm344_vm2, %v355_v22 }
 0x355   : > { %v379_v24 = vpop.f32.mrf.mxu2 }
 0x356   : > { %580 = vmatmul.msk.f32.vlgmr.msra.gmra.mxu3 %vm292_vm1, %v379_v24 }
 0x3d8   : > { %415 = sbr.rel (%p581_p4) target bundleno = 997 (0x3e5), region = 52 }
 0x3d9   : > { %v407_v26 = vpop.f32.mrf.mxu3 }
 0x3da   : > { %v410_v27 = vadd.f32 %v407_v26, %v382_v25 }
 0x3dc   : > { %411 = vst.msk [vmem:[#allocation2] sm:$0xff] %vm292_vm1, %v410_v27 }
 0x3e3   : > { %v416_v28 = vld [vmem:[#allocation2] sm:$0xff] }
 0x3e4   : > { %417 = vst.msk [vmem:[%s1154_s26] sm:$0xff] %vm292_vm1, %v416_v28 }
 0x3e5 PF: > { %s583_s9 = sshll.u32 %s913_s19, 3  ;;  %s431_s28 = sshll.u32 %s1154_s26, 4  ;;  %s432_s28 = int_to_ptr.vmem [resolvable:$true] %s431_s28 }
 0x3e6   : > { %s429_s24 = scalar_lea.hbm %s1228_s3, %s583_s9  ;;  %s419_s18 = scalar_lea.sflag [#allocation5], %s1138_s2 }
 0x3e7   : > { %s433_s25 = sshll.u32 %s429_s24, 4  ;;  %s819_s19 = scalar_lea.hbm %s1228_s3, 16  ;;  %s434_s25 = int_to_ptr.hbm [resolvable:$true] %s433_s25 }
 0x3e8   : > { %s813_s29 = sshra.s32 %s434_s25, 4  ;;  %s814_s29 = int_to_ptr.hbm [resolvable:$true] %s813_s29 }
 0x3e9   : > { %s815_s23 = scalar_lea.hbm %s814_s29, 8  ;;  %p820_p13 = scmp.lt.s32.totalorder %s814_s29, %s1228_s3 }
 0x3ea   : > { %p816_p6 = scmp.ne.s32.totalorder %s814_s29, %s815_s23  ;;  %p821_p3 = scmp.lt.s32.totalorder %s819_s19, %s815_s23 }
 0x3ec   : > { %p817_p10 = pnand %p816_p6, %p1103_p11  ;;  %p822_p1 = por %p821_p3, %p820_p13 }
 0x3ee   : > { %p818_p12 = pneg %p817_p10 }
 0x3f0   : > { %p823_p8 = pnand %p822_p1, %p818_p12 }
 0x3f2   : > { %826 = shalt.err (!%p823_p8)
}
 0x3f3   : > { %594 = dma.vmem_to_hbm [thread:$0]  (%p1103_p11), %s432_s28, 128, %s434_s25, %s419_s18  }
 0x3f4 PF: > { %p611_p9 = scmp.ge.s32.totalorder %s925_s22, 2  ;;  %s445_s2 = sand.u32 1, %s897_s15  }
 0x3f5   : > { %s446_s17 = scalar_lea.sflag [#allocation5], %s445_s2 }
 0x3f6   : > { %p607_p7 = pnand %p611_p9, %p1116_p2 }
 0x3f8   : > { %p608_p5 = pneg %p607_p7 }
 0x3fa   : > { %880 = dma.done.wait (%p608_p5), %s446_s17, 128  }
 0x3fb   : > { %882 = vsyncadd (%p608_p5), %s446_s17, 4294967168  ;;  %s22_s22 = sadd.s32 1, %s925_s22   ;;  %s1257_s20 = sld [smem:[#allocation13_spill]] }
 0x3fc   : > { %p19_p0 = scmp.ge.s32.totalorder %s22_s22, 6   ;;  %s1258_s14 = sld [smem:[#allocation17_spill]] }
 0x3fd   : > { %s1259_s8 = sld [smem:[#allocation14_spill]]  ;;  %s1264_s12 = smov %s889_s13 }
 0x3fe   : > { %s1260_s17 = sld [smem:[#allocation19_spill]]  ;;  %s1266_s15 = smov %s901_s16 }
 0x3ff   : > { %s1261_s18 = sld [smem:[#allocation15_spill]]  ;;  %s1268_s19 = smov %s921_s21 }
 0x400   : > { %s1262_s27 = sld [smem:[#allocation16_spill]] }
 0x401   : > { %s1263_s7 = sld [smem:[#allocation18_spill]]  ;;  %s1265_s13 = smov %s1257_s20 }
 0x403   : > { %s1267_s16 = smov %s1259_s8  ;;  %21 = sbr.rel (!%p19_p0) target bundleno = 14 (0xe), region = 109 }
 0x406   : > { %s1269_s20 = smov %s1262_s27 }
 0x407   : > { %s1270_s21 = smov %s1263_s7 }
 0x408   :  { %452 = vsyncpa [#allocation4], 1 }
 0x409   :  { %454 = vsyncpa [#allocation4 + $0x1], 1 }
 0x40a   :  { %455 = vsyncpa [#allocation7], 1 }
 0x40b   :  { %457 = vsyncpa [#allocation7 + $0x1], 1 }
 0x40c   :  { %458 = vsyncpa [#allocation5], 1 }
 0x40d   :  { %460 = vsyncpa [#allocation5 + $0x1], 1 }

</bundles_post_ra>
